<compile_context>
chip_gen: v6e
topology: v6e:2x2x1
jax: 0.10.0
libtpu: 0.0.40
codegen_flags: <defaults>
</compile_context>

<pallas_src>
import jax
import jax.numpy as jnp
from jax.experimental import pallas as pl
from jax.experimental.pallas import tpu as pltpu

# ---------------- small configuration consistent with the module -------------
B = 2      # batch of systems
S = 4      # frames per system (reduced by logsumexp(-2))
N = 8      # fine-grained particles fed to `mapping`
K = 4      # mapping.coarse_grain_particles
R = 8      # smearing.num_rbf
H = 32     # hidden_features
P = K * K
F = R * P          # in_features = num_rbf * coarse_grain_particles**2 = 128

G = B * S          # one row per (batch, frame)              = 8
DR = 3 * G         # rows of the xyz-major coordinate slab    = 24
KP = 8             # K padded to a full sublane group

CUTOFF_LOWER = 0.0
CUTOFF_UPPER = 5.0
ALPHA = 5.0 / (CUTOFF_UPPER - CUTOFF_LOWER)
EPS_NORM = 1e-5
EPS_ATT = 1e-5

HIGHEST = jax.lax.Precision.HIGHEST


# ------------------------------- Pallas kernel --------------------------------
def lillet_kernel(xcg_ref, exp_ref, mb_ref, wlt_ref, wrt_ref, head_ref, out_ref):
    xcg = xcg_ref[...]                                   # (DR, KP) coarse coords
    e = exp_ref[...]                                     # (KP, F) 0/±1 pair matrix

    # In-kernel pair/RBF expansion (exact f32 VPU, K tiny -> static unroll):
    # delta[row, f] = xcg[row, j(f)] - xcg[row, i(f)]
    delta = xcg[:, 0:1] * e[0:1, :]                      # (DR, F)
    for k in range(1, K):
        delta = delta + xcg[:, k:k + 1] * e[k:k + 1, :]

    # ||delta|| over xyz: three aligned (G, F) sublane groups.
    d0 = delta[0:G, :]
    d1 = delta[G:2 * G, :]
    d2 = delta[2 * G:3 * G, :]
    # TODO(synk): eps is added inside the sqrt (as in the PyTorch layer's
    # ((..).sum + 1e-5) ** 0.5); some ExpNormalSmearing variants differ.
    norm = jnp.sqrt(d0 * d0 + d1 * d1 + d2 * d2 + EPS_NORM)          # (G, F)

    # ExpNormal smearing: exp(-beta * (exp(alpha*(lo - d)) - mean)^2)
    # TODO(synk): reference ExpNormalSmearing may also multiply a CosineCutoff
    # envelope / use trainable means & betas; the bare exp-normal RBF is used here.
    mb = mb_ref[...]                                     # (2, F)
    means = mb[0:1, :]
    betas = mb[1:2, :]
    smear = jnp.exp(-betas * (jnp.exp(ALPHA * (CUTOFF_LOWER - norm)) - means) ** 2)

    # basis keeps delta's (d, b, s) row layout.
    basis = jnp.concatenate([d0 * smear, d1 * smear, d2 * smear], axis=0)   # (DR, F)

    # Two basis projections as separate MXU dots (keeps the product lane-aligned).
    left = jnp.dot(basis, wlt_ref[...], preferred_element_type=jnp.float32)   # (DR, H)
    right = jnp.dot(basis, wrt_ref[...], preferred_element_type=jnp.float32)  # (DR, H)
    prod = left * right                                                       # (DR, H)
    # attention dot = sum over xyz (three aligned sublane groups), + eps
    att = prod[0:G, :] + prod[G:2 * G, :] + prod[2 * G:3 * G, :] + EPS_ATT    # (G, H)

    # logsumexp over the S frames of each batch (B tiny, static unroll).
    lses = []
    for b in range(B):
        a = att[b * S:(b + 1) * S, :]                    # (S, H)
        m = jnp.max(a, axis=0, keepdims=True)            # (1, H)
        lses.append(m + jnp.log(jnp.sum(jnp.exp(a - m), axis=0, keepdims=True)))
    lse = jnp.concatenate(lses, axis=0)                  # (B, H)

    # fc head, batched over B: Linear(H,H) -> SiLU -> Linear(H,1)
    # head is (40, 128), zero-padded: padded lanes stay zero through bias/SiLU/w2.
    head = head_ref[...]
    w1t = head[0:H, :]                                   # (H, 128) = fc[0].weight^T (padded)
    b1 = head[H:H + 1, :]                                # (1, 128) = fc[0].bias     (padded)
    w2 = head[H + 1:H + 2, :]                            # (1, 128) = fc[2].weight   (padded)
    b2 = head[H + 2:H + 3, 0:1]                          # (1, 1)   = fc[2].bias
    h1 = jnp.dot(lse, w1t, preferred_element_type=jnp.float32) + b1          # (B, 128)
    h1 = h1 * jax.nn.sigmoid(h1)                         # SiLU (padded lanes stay 0)
    out_ref[...] = jnp.sum(h1 * w2, axis=1, keepdims=True) + b2              # (B, 1)


# ------------------------------- parameters -----------------------------------
def init_params(key):
    ks = jax.random.split(key, 7)
    start = jnp.exp(jnp.float32(-(CUTOFF_UPPER - CUTOFF_LOWER)))
    means = jnp.linspace(start, 1.0, R).astype(jnp.float32)
    betas = jnp.full((R,), ((2.0 / R) * (1.0 - start)) ** -2, dtype=jnp.float32)
    return dict(
        # TODO(synk): `mapping` is a constructor-injected nn.Module; modeled here
        # as a synthetic linear coarse-graining (K, N) applied to particle coords.
        mapping=jax.random.normal(ks[0], (K, N), jnp.float32) / jnp.sqrt(N),
        means=means,
        betas=betas,
        wl=jax.random.normal(ks[1], (H, F), jnp.float32) / jnp.sqrt(F),   # fc_basis_left.weight
        wr=jax.random.normal(ks[2], (H, F), jnp.float32) / jnp.sqrt(F),   # fc_basis_right.weight
        w1=jax.random.normal(ks[3], (H, H), jnp.float32) / jnp.sqrt(H),   # fc[0].weight
        b1=jax.random.normal(ks[4], (H,), jnp.float32) * 0.1,             # fc[0].bias
        w2=jax.random.normal(ks[5], (1, H), jnp.float32) / jnp.sqrt(H),   # fc[2].weight
        b2=jax.random.normal(ks[6], (1,), jnp.float32) * 0.1,             # fc[2].bias
    )


def pack_params(p):
    """One-time packing of kernel parameter blocks (runs eagerly, outside jit)."""
    # mapping padded to KP rows so the wrapper einsum lands directly in the
    # sublane-aligned (DR, KP) slab consumed by the kernel.
    mapping_pad = jnp.concatenate(
        [p['mapping'], jnp.zeros((KP - K, N), jnp.float32)], axis=0)      # (KP, N)

    # pair-difference expansion matrix: E[k, f] = [k == j(f)] - [k == i(f)],
    # lane f = (i*K + j)*R + r ; padded rows K..KP-1 are zero.
    ii = jnp.repeat(jnp.arange(K), K)                    # pair p = i*K + j -> i
    jj = jnp.tile(jnp.arange(K), K)                      # pair p            -> j
    epair = (jax.nn.one_hot(jj, KP, axis=0)
             - jax.nn.one_hot(ii, KP, axis=0)).astype(jnp.float32)        # (KP, P)
    expand = jnp.repeat(epair, R, axis=1)                                 # (KP, F)

    mb = jnp.stack([jnp.tile(p['means'], P),
                    jnp.tile(p['betas'], P)], axis=0)                     # (2, F)

    wlt = p['wl'].T                                                       # (F, H)
    wrt = p['wr'].T                                                       # (F, H)

    # head block zero-padded to (40, 128): sublane multiple of 8, lane-dense.
    head = jnp.zeros((40, 128), jnp.float32)
    head = head.at[0:H, 0:H].set(p['w1'].T)              # fc[0].weight^T
    head = head.at[H, 0:H].set(p['b1'])                  # fc[0].bias
    head = head.at[H + 1, 0:H].set(p['w2'][0])           # fc[2].weight
    head = head.at[H + 2, :].set(p['b2'][0])             # fc[2].bias (lane 0 read)

    return dict(mapping_pad=mapping_pad, expand=expand, mb=mb,
                wlt=wlt, wrt=wrt, head=head)


# ------------------------------- wrapper ---------------------------------------
@jax.jit
def lillet_forward(x, packed):
    # mapping module (glue): fine particles -> coarse-grained particles, emitted
    # directly in the xyz-major (DR, KP) row layout the kernel consumes.  This is
    # the only XLA op in the per-call path besides the pallas_call.
    xcg = jnp.einsum('kn,bsnd->dbsk', packed['mapping_pad'], x,
                     precision=HIGHEST).reshape(DR, KP)

    vmem = pl.BlockSpec(memory_space=pltpu.MemorySpace.VMEM)
    return pl.pallas_call(
        lillet_kernel,
        out_shape=jax.ShapeDtypeStruct((B, 1), jnp.float32),
        in_specs=[vmem] * 6,         # whole arrays in VMEM, no grid, no pipelining
        out_specs=vmem,
    )(xcg, packed['expand'], packed['mb'], packed['wlt'], packed['wrt'],
      packed['head'])


# ------------------------------- pure-JAX reference ----------------------------
# Same default matmul precision as the kernel so the check compares like for like.
def lillet_reference(x, params):
    xcg = jnp.einsum('kn,bsnd->bskd', params['mapping'], x, precision=HIGHEST)
    delta = xcg[..., None, :, :] - xcg[..., :, None, :]                  # (B,S,K,K,3)
    norm = jnp.sqrt(jnp.sum(delta ** 2, axis=-1, keepdims=True) + EPS_NORM)
    smear = jnp.exp(-params['betas'] *
                    (jnp.exp(ALPHA * (CUTOFF_LOWER - norm)) - params['means']) ** 2)
    basis = delta[..., None, :] * smear[..., None]                       # (B,S,K,K,R,3)
    basis = basis.reshape(*basis.shape[:-4], -1, basis.shape[-1])        # (B,S,F,3)
    bt = jnp.swapaxes(basis, -2, -1)                                     # (B,S,3,F)
    left = jnp.einsum('bsdf,hf->bsdh', bt, params['wl'])                 # (B,S,3,H)
    right = jnp.einsum('bsdf,hf->bsdh', bt, params['wr'])
    att = jnp.sum(left * right, axis=-2) + EPS_ATT                       # (B,S,H)
    att = jax.scipy.special.logsumexp(att, axis=-2)                      # (B,H)
    h1 = jnp.einsum('bh,kh->bk', att, params['w1']) + params['b1']
    h1 = h1 * jax.nn.sigmoid(h1)
    return jnp.sum(h1 * params['w2'], axis=-1, keepdims=True) + params['b2']


if __name__ == "__main__":
    key = jax.random.PRNGKey(0)
    pkey, xkey = jax.random.split(key)
    params = init_params(pkey)
    packed = pack_params(params)          # packed ONCE, outside the per-call path
    x = jax.random.normal(xkey, (B, S, N, 3), jnp.float32)

    out = jax.block_until_ready(lillet_forward(x, packed))
    assert out.shape == (B, 1)

    ref = lillet_reference(x, params)
    if not jnp.allclose(out, ref, rtol=1e-3, atol=1e-3):
        raise AssertionError(f"kernel/reference mismatch:\n{out}\nvs\n{ref}")

    print("KERNEL_OK")
</pallas_src>

<mosaic_0001>
module attributes {stable_mosaic.version = 11 : i64} {
  func.func @lillet_kernel(%arg0: memref<24x8xf32, #tpu.memory_space<vmem>>, %arg1: memref<8x128xf32, #tpu.memory_space<vmem>>, %arg2: memref<2x128xf32, #tpu.memory_space<vmem>>, %arg3: memref<128x32xf32, #tpu.memory_space<vmem>>, %arg4: memref<128x32xf32, #tpu.memory_space<vmem>>, %arg5: memref<40x128xf32, #tpu.memory_space<vmem>>, %arg6: memref<2x1xf32, #tpu.memory_space<vmem>>) attributes {dimension_semantics = [], scalar_prefetch = 0 : i64, scratch_operands = 0 : i64, tpu.core_type = #tpu.core_type<tc>} {
    %c0 = arith.constant 0 : index
    %c0_0 = arith.constant 0 : index
    %0 = vector.load %arg0[%c0, %c0_0] : memref<24x8xf32, #tpu.memory_space<vmem>>, vector<24x8xf32>
    %c0_1 = arith.constant 0 : index
    %c0_2 = arith.constant 0 : index
    %1 = vector.load %arg1[%c0_1, %c0_2] : memref<8x128xf32, #tpu.memory_space<vmem>>, vector<8x128xf32>
    %2 = vector.extract_strided_slice %0 {offsets = [0, 0], sizes = [24, 1], strides = [1, 1]} : vector<24x8xf32> to vector<24x1xf32>
    %3 = vector.extract_strided_slice %1 {offsets = [0, 0], sizes = [1, 128], strides = [1, 1]} : vector<8x128xf32> to vector<1x128xf32>
    %4 = vector.broadcast %2 : vector<24x1xf32> to vector<24x128xf32>
    %5 = vector.broadcast %3 : vector<1x128xf32> to vector<24x128xf32>
    %6 = arith.mulf %4, %5 : vector<24x128xf32>
    %7 = vector.extract_strided_slice %0 {offsets = [0, 1], sizes = [24, 1], strides = [1, 1]} : vector<24x8xf32> to vector<24x1xf32>
    %8 = vector.extract_strided_slice %1 {offsets = [1, 0], sizes = [1, 128], strides = [1, 1]} : vector<8x128xf32> to vector<1x128xf32>
    %9 = vector.broadcast %7 : vector<24x1xf32> to vector<24x128xf32>
    %10 = vector.broadcast %8 : vector<1x128xf32> to vector<24x128xf32>
    %11 = arith.mulf %9, %10 : vector<24x128xf32>
    %12 = arith.addf %6, %11 : vector<24x128xf32>
    %13 = vector.extract_strided_slice %0 {offsets = [0, 2], sizes = [24, 1], strides = [1, 1]} : vector<24x8xf32> to vector<24x1xf32>
    %14 = vector.extract_strided_slice %1 {offsets = [2, 0], sizes = [1, 128], strides = [1, 1]} : vector<8x128xf32> to vector<1x128xf32>
    %15 = vector.broadcast %13 : vector<24x1xf32> to vector<24x128xf32>
    %16 = vector.broadcast %14 : vector<1x128xf32> to vector<24x128xf32>
    %17 = arith.mulf %15, %16 : vector<24x128xf32>
    %18 = arith.addf %12, %17 : vector<24x128xf32>
    %19 = vector.extract_strided_slice %0 {offsets = [0, 3], sizes = [24, 1], strides = [1, 1]} : vector<24x8xf32> to vector<24x1xf32>
    %20 = vector.extract_strided_slice %1 {offsets = [3, 0], sizes = [1, 128], strides = [1, 1]} : vector<8x128xf32> to vector<1x128xf32>
    %21 = vector.broadcast %19 : vector<24x1xf32> to vector<24x128xf32>
    %22 = vector.broadcast %20 : vector<1x128xf32> to vector<24x128xf32>
    %23 = arith.mulf %21, %22 : vector<24x128xf32>
    %24 = arith.addf %18, %23 : vector<24x128xf32>
    %25 = vector.extract_strided_slice %24 {offsets = [0, 0], sizes = [8, 128], strides = [1, 1]} : vector<24x128xf32> to vector<8x128xf32>
    %26 = vector.extract_strided_slice %24 {offsets = [8, 0], sizes = [8, 128], strides = [1, 1]} : vector<24x128xf32> to vector<8x128xf32>
    %27 = vector.extract_strided_slice %24 {offsets = [16, 0], sizes = [8, 128], strides = [1, 1]} : vector<24x128xf32> to vector<8x128xf32>
    %28 = arith.mulf %25, %25 : vector<8x128xf32>
    %29 = arith.mulf %26, %26 : vector<8x128xf32>
    %30 = arith.addf %28, %29 : vector<8x128xf32>
    %31 = arith.mulf %27, %27 : vector<8x128xf32>
    %32 = arith.addf %30, %31 : vector<8x128xf32>
    %cst = arith.constant 9.99999974E-6 : f32
    %33 = vector.broadcast %cst : f32 to vector<8x128xf32>
    %34 = arith.addf %32, %33 : vector<8x128xf32>
    %35 = math.sqrt %34 : vector<8x128xf32>
    %c0_3 = arith.constant 0 : index
    %c0_4 = arith.constant 0 : index
    %36 = vector.load %arg2[%c0_3, %c0_4] : memref<2x128xf32, #tpu.memory_space<vmem>>, vector<2x128xf32>
    %37 = vector.extract_strided_slice %36 {offsets = [0, 0], sizes = [1, 128], strides = [1, 1]} : vector<2x128xf32> to vector<1x128xf32>
    %38 = vector.extract_strided_slice %36 {offsets = [1, 0], sizes = [1, 128], strides = [1, 1]} : vector<2x128xf32> to vector<1x128xf32>
    %cst_5 = arith.constant 0.000000e+00 : f32
    %39 = vector.broadcast %cst_5 : f32 to vector<1x128xf32>
    %40 = arith.subf %39, %38 : vector<1x128xf32>
    %cst_6 = arith.constant 0.000000e+00 : f32
    %41 = vector.broadcast %cst_6 : f32 to vector<8x128xf32>
    %42 = arith.subf %41, %35 : vector<8x128xf32>
    %cst_7 = arith.constant 1.000000e+00 : f32
    %43 = vector.broadcast %cst_7 : f32 to vector<8x128xf32>
    %44 = arith.mulf %43, %42 : vector<8x128xf32>
    %45 = math.exp %44 : vector<8x128xf32>
    %46 = vector.broadcast %37 : vector<1x128xf32> to vector<8x128xf32>
    %47 = arith.subf %45, %46 : vector<8x128xf32>
    %48 = arith.mulf %47, %47 : vector<8x128xf32>
    %49 = vector.broadcast %40 : vector<1x128xf32> to vector<8x128xf32>
    %50 = arith.mulf %49, %48 : vector<8x128xf32>
    %51 = math.exp %50 : vector<8x128xf32>
    %52 = arith.mulf %25, %51 : vector<8x128xf32>
    %53 = arith.mulf %26, %51 : vector<8x128xf32>
    %54 = arith.mulf %27, %51 : vector<8x128xf32>
    %55 = tpu.concatenate %52, %53, %54 in 0 : vector<8x128xf32>, vector<8x128xf32>, vector<8x128xf32> -> vector<24x128xf32>
    %c0_8 = arith.constant 0 : index
    %c0_9 = arith.constant 0 : index
    %56 = vector.load %arg3[%c0_8, %c0_9] : memref<128x32xf32, #tpu.memory_space<vmem>>, vector<128x32xf32>
    %cst_10 = arith.constant dense<0.000000e+00> : vector<24x32xf32>
    %57 = tpu.matmul %55, %56, %cst_10 {dimension_numbers = #tpu.dot_dimension_numbers<[1], [0], [0], [1], [0, 0, 1, 1], [], []>} : vector<24x128xf32>, vector<128x32xf32>, vector<24x32xf32> -> vector<24x32xf32>
    %c0_11 = arith.constant 0 : index
    %c0_12 = arith.constant 0 : index
    %58 = vector.load %arg4[%c0_11, %c0_12] : memref<128x32xf32, #tpu.memory_space<vmem>>, vector<128x32xf32>
    %cst_13 = arith.constant dense<0.000000e+00> : vector<24x32xf32>
    %59 = tpu.matmul %55, %58, %cst_13 {dimension_numbers = #tpu.dot_dimension_numbers<[1], [0], [0], [1], [0, 0, 1, 1], [], []>} : vector<24x128xf32>, vector<128x32xf32>, vector<24x32xf32> -> vector<24x32xf32>
    %60 = arith.mulf %57, %59 : vector<24x32xf32>
    %61 = vector.extract_strided_slice %60 {offsets = [0, 0], sizes = [8, 32], strides = [1, 1]} : vector<24x32xf32> to vector<8x32xf32>
    %62 = vector.extract_strided_slice %60 {offsets = [8, 0], sizes = [8, 32], strides = [1, 1]} : vector<24x32xf32> to vector<8x32xf32>
    %63 = arith.addf %61, %62 : vector<8x32xf32>
    %64 = vector.extract_strided_slice %60 {offsets = [16, 0], sizes = [8, 32], strides = [1, 1]} : vector<24x32xf32> to vector<8x32xf32>
    %65 = arith.addf %63, %64 : vector<8x32xf32>
    %cst_14 = arith.constant 9.99999974E-6 : f32
    %66 = vector.broadcast %cst_14 : f32 to vector<8x32xf32>
    %67 = arith.addf %65, %66 : vector<8x32xf32>
    %68 = vector.extract_strided_slice %67 {offsets = [0, 0], sizes = [4, 32], strides = [1, 1]} : vector<8x32xf32> to vector<4x32xf32>
    %cst_15 = arith.constant dense<0xFF800000> : vector<32xf32>
    %69 = vector.multi_reduction <maximumf>, %68, %cst_15 [0] : vector<4x32xf32> to vector<32xf32>
    %70 = vector.shape_cast %69 : vector<32xf32> to vector<1x32xf32>
    %71 = vector.broadcast %70 : vector<1x32xf32> to vector<4x32xf32>
    %72 = arith.subf %68, %71 : vector<4x32xf32>
    %73 = math.exp %72 : vector<4x32xf32>
    %cst_16 = arith.constant dense<0.000000e+00> : vector<32xf32>
    %74 = vector.multi_reduction <add>, %73, %cst_16 [0] : vector<4x32xf32> to vector<32xf32>
    %75 = vector.shape_cast %74 : vector<32xf32> to vector<1x32xf32>
    %76 = math.log %75 : vector<1x32xf32>
    %77 = arith.addf %70, %76 : vector<1x32xf32>
    %78 = vector.extract_strided_slice %67 {offsets = [4, 0], sizes = [4, 32], strides = [1, 1]} : vector<8x32xf32> to vector<4x32xf32>
    %cst_17 = arith.constant dense<0xFF800000> : vector<32xf32>
    %79 = vector.multi_reduction <maximumf>, %78, %cst_17 [0] : vector<4x32xf32> to vector<32xf32>
    %80 = vector.shape_cast %79 : vector<32xf32> to vector<1x32xf32>
    %81 = vector.broadcast %80 : vector<1x32xf32> to vector<4x32xf32>
    %82 = arith.subf %78, %81 : vector<4x32xf32>
    %83 = math.exp %82 : vector<4x32xf32>
    %cst_18 = arith.constant dense<0.000000e+00> : vector<32xf32>
    %84 = vector.multi_reduction <add>, %83, %cst_18 [0] : vector<4x32xf32> to vector<32xf32>
    %85 = vector.shape_cast %84 : vector<32xf32> to vector<1x32xf32>
    %86 = math.log %85 : vector<1x32xf32>
    %87 = arith.addf %80, %86 : vector<1x32xf32>
    %88 = tpu.concatenate %77, %87 in 0 : vector<1x32xf32>, vector<1x32xf32> -> vector<2x32xf32>
    %c0_19 = arith.constant 0 : index
    %c0_20 = arith.constant 0 : index
    %89 = vector.load %arg5[%c0_19, %c0_20] : memref<40x128xf32, #tpu.memory_space<vmem>>, vector<40x128xf32>
    %90 = vector.extract_strided_slice %89 {offsets = [0, 0], sizes = [32, 128], strides = [1, 1]} : vector<40x128xf32> to vector<32x128xf32>
    %91 = vector.extract_strided_slice %89 {offsets = [32, 0], sizes = [1, 128], strides = [1, 1]} : vector<40x128xf32> to vector<1x128xf32>
    %92 = vector.extract_strided_slice %89 {offsets = [33, 0], sizes = [1, 128], strides = [1, 1]} : vector<40x128xf32> to vector<1x128xf32>
    %93 = vector.extract_strided_slice %89 {offsets = [34, 0], sizes = [1, 1], strides = [1, 1]} : vector<40x128xf32> to vector<1x1xf32>
    %cst_21 = arith.constant dense<0.000000e+00> : vector<2x128xf32>
    %94 = tpu.matmul %88, %90, %cst_21 {dimension_numbers = #tpu.dot_dimension_numbers<[1], [0], [0], [1], [0, 0, 1, 1], [], []>} : vector<2x32xf32>, vector<32x128xf32>, vector<2x128xf32> -> vector<2x128xf32>
    %95 = vector.broadcast %91 : vector<1x128xf32> to vector<2x128xf32>
    %96 = arith.addf %94, %95 : vector<2x128xf32>
    %97 = arith.negf %96 : vector<2x128xf32>
    %98 = math.exp %97 : vector<2x128xf32>
    %cst_22 = arith.constant 1.000000e+00 : f32
    %99 = vector.broadcast %cst_22 : f32 to vector<2x128xf32>
    %100 = arith.addf %99, %98 : vector<2x128xf32>
    %101 = arith.divf %99, %100 : vector<2x128xf32>
    %102 = arith.mulf %96, %101 : vector<2x128xf32>
    %103 = vector.broadcast %92 : vector<1x128xf32> to vector<2x128xf32>
    %104 = arith.mulf %102, %103 : vector<2x128xf32>
    %cst_23 = arith.constant dense<0.000000e+00> : vector<2xf32>
    %105 = vector.multi_reduction <add>, %104, %cst_23 [1] : vector<2x128xf32> to vector<2xf32>
    %106 = vector.shape_cast %105 : vector<2xf32> to vector<2x1xf32>
    %107 = vector.broadcast %93 : vector<1x1xf32> to vector<2x1xf32>
    %108 = arith.addf %106, %107 : vector<2x1xf32>
    %c0_24 = arith.constant 0 : index
    %c0_25 = arith.constant 0 : index
    %109 = vector.load %arg6[%c0_24, %c0_25] : memref<2x1xf32, #tpu.memory_space<vmem>>, vector<2x1xf32>
    tpu.vector_store %arg6[%c0_24, %c0_25], %108 {strides = array<i32>} : memref<2x1xf32, #tpu.memory_space<vmem>>, vector<2x1xf32>,
    return
  }
}

</mosaic_0001>

<bundles_post_ra>
// kernel: lillet_forward.1
= control target key start
LH: loop header
LB: loop body
LE: loop exit
PB: predicated region body
PF: predicated region fallthrough
CT: control target
= control target key end

     0   :  { %v672_v0 = vmov 1   ;;  %v673_v1 = vmov 0   ;;  %v674_v5 = vmov 2   ;;  %v675_v6 = vmov 3   ;;  %s915_s0 = inlined_call_operand.vmem [shape: f32[24,8], index: 0, kind: input, shape index: {}]   ;;  %s916_s3 = inlined_call_operand.vmem [shape: f32[128,32], index: 3, kind: input, shape index: {}]   ;;  %s917_s4 = inlined_call_operand.vmem [shape: f32[128,32], index: 4, kind: input, shape index: {}]   ;;  %s918_s1 = inlined_call_operand.vmem [shape: f32[8,128], index: 1, kind: input, shape index: {}]   ;;  %s919_s2 = inlined_call_operand.vmem [shape: f32[2,128], index: 2, kind: input, shape index: {}]   ;;  %s920_s5 = inlined_call_operand.vmem [shape: f32[40,128], index: 5, kind: input, shape index: {}]   ;;  %s921_s6 = inlined_call_operand.vmem [shape: f32[2,1], index: 6, kind: output, shape index: {}]  }
   0x1   :  { %649 = vset.pattern.permute.xlu1 %v672_v0  ;;  %648 = vset.pattern.permute.xlu0 %v673_v1  ;;  %v23_v2 = vld [vmem:[%s915_s0] sm:$0xff]  ;;  %v24_v3 = vld [vmem:[%s915_s0 + $0x8] sm:$0xff]  ;;  %v25_v4 = vld [vmem:[%s915_s0 + $0x10] sm:$0xff]  ;;  %v676_v7 = vmov 0.0   ;;  %vm677_vm0 = vmmov 0   ;;  %v42_v40 = vlaneseq  ;;  %vm347_vm3 = vcmask 257024  }
   0x2   :  { %50 = vperm.xlu1 %649, %v23_v2   ;;  %29 = vperm.xlu0 %648, %v23_v2   ;;  %v164_v8 = vld [vmem:[%s916_s3 + $0x78] sm:$0xff]  ;;  %v163_v10 = vld [vmem:[%s916_s3 + $0x70] sm:$0xff]  ;;  %v162_v12 = vld [vmem:[%s916_s3 + $0x68] sm:$0xff]  ;;  %vm368_vm4 = vcmask 261124   ;;  %vm392_vm5 = vcmask 1040384   ;;  %vm403_vm6 = vcmask 261120  }
   0x3   :  { %549 = vmatprep.subr.mxu0 %v676_v7  ;;  %590 = vmatprep.subr.mxu1 %v676_v7  ;;  %v260_v9 = vld [vmem:[%s917_s4 + $0x78] sm:$0xff]  ;;  %v259_v11 = vld [vmem:[%s917_s4 + $0x70] sm:$0xff]  ;;  %v258_v13 = vld [vmem:[%s917_s4 + $0x68] sm:$0xff]  ;;  %v855_v43 = vshrl.u32 %v42_v40, 7  ;;  %vm489_vm7 = vcmask 1041408   ;;  %vm498_vm8 = vcmask 1024  }
   0x4   :  { %550 = vmatpush3.msra.mxu0 %v164_v8  ;;  %591 = vmatpush3.msra.mxu1 %v260_v9  ;;  %v161_v14 = vld [vmem:[%s916_s3 + $0x60] sm:$0xff]  ;;  %v160_v16 = vld [vmem:[%s916_s3 + $0x58] sm:$0xff]  ;;  %v159_v18 = vld [vmem:[%s916_s3 + $0x50] sm:$0xff] }
   0x5   :  { %551 = vmatprep.subr.mxu0 %v676_v7  ;;  %592 = vmatprep.subr.mxu1 %v676_v7  ;;  %v257_v15 = vld [vmem:[%s917_s4 + $0x60] sm:$0xff]  ;;  %v256_v17 = vld [vmem:[%s917_s4 + $0x58] sm:$0xff]  ;;  %v255_v19 = vld [vmem:[%s917_s4 + $0x50] sm:$0xff]  ;;  %v858_v46 = vsub.s32 1, %v855_v43  ;;  %v861_v47 = vsub.s32 0, %v855_v43  ;;  %v85_v51 = vsub.s32 2, %v855_v43 }
   0x6   :  { %54 = vperm.xlu1 %649, %v24_v3   ;;  %34 = vperm.xlu0 %648, %v24_v3   ;;  %v158_v20 = vld [vmem:[%s916_s3 + $0x48] sm:$0xff]  ;;  %v157_v22 = vld [vmem:[%s916_s3 + $0x40] sm:$0xff]  ;;  %v156_v24 = vld [vmem:[%s916_s3 + $0x38] sm:$0xff]  ;;  %v107_v56 = vsub.s32 3, %v855_v43 }
   0x7   :  { %552 = vmatpush3.msra.mxu0 %v163_v10  ;;  %593 = vmatpush3.msra.mxu1 %v259_v11  ;;  %v254_v21 = vld [vmem:[%s917_s4 + $0x48] sm:$0xff]  ;;  %v253_v23 = vld [vmem:[%s917_s4 + $0x40] sm:$0xff]  ;;  %v252_v25 = vld [vmem:[%s917_s4 + $0x38] sm:$0xff] }
   0x8   :  { %553 = vmatprep.subr.mxu0 %v676_v7  ;;  %594 = vmatprep.subr.mxu1 %v676_v7  ;;  %v155_v26 = vld [vmem:[%s916_s3 + $0x30] sm:$0xff]  ;;  %v154_v28 = vld [vmem:[%s916_s3 + $0x28] sm:$0xff]  ;;  %v153_v30 = vld [vmem:[%s916_s3 + $0x20] sm:$0xff] }
   0x9   :  { %554 = vmatpush3.msra.mxu0 %v162_v12  ;;  %595 = vmatpush3.msra.mxu1 %v258_v13  ;;  %v251_v27 = vld [vmem:[%s917_s4 + $0x30] sm:$0xff]  ;;  %v250_v29 = vld [vmem:[%s917_s4 + $0x28] sm:$0xff]  ;;  %v249_v31 = vld [vmem:[%s917_s4 + $0x20] sm:$0xff] }
   0xa   :  { %58 = vperm.xlu1 %649, %v25_v4   ;;  %39 = vperm.xlu0 %648, %v25_v4   ;;  %v152_v32 = vld [vmem:[%s916_s3 + $0x18] sm:$0xff]  ;;  %v151_v34 = vld [vmem:[%s916_s3 + $0x10] sm:$0xff]  ;;  %v150_v36 = vld [vmem:[%s916_s3 + $0x8] sm:$0xff] }
   0xb   :  { %555 = vmatprep.subr.mxu0 %v676_v7  ;;  %596 = vmatprep.subr.mxu1 %v676_v7  ;;  %v248_v33 = vld [vmem:[%s917_s4 + $0x18] sm:$0xff]  ;;  %v247_v35 = vld [vmem:[%s917_s4 + $0x10] sm:$0xff]  ;;  %v246_v37 = vld [vmem:[%s917_s4 + $0x8] sm:$0xff] }
   0xc   :  { %556 = vmatpush3.msra.mxu0 %v161_v14  ;;  %597 = vmatpush3.msra.mxu1 %v257_v15  ;;  %v149_v38 = vld [vmem:[%s916_s3] sm:$0xff] }
   0xd   :  { %557 = vmatprep.subr.mxu0 %v676_v7  ;;  %598 = vmatprep.subr.mxu1 %v676_v7  ;;  %v245_v39 = vld [vmem:[%s917_s4] sm:$0xff] }
   0xe   :  { %651 = vset.pattern.permute.xlu1 %v674_v5  ;;  %650 = vset.pattern.permute.xlu0 %v674_v5  ;;  %v26_v50 = vld [vmem:[%s918_s1] sm:$0xff] }
   0xf   :  { %76 = vperm.xlu1 %651, %v24_v3   ;;  %72 = vperm.xlu0 %650, %v23_v2   ;;  %v64_v52 = vrot.slane %v26_v50, %v858_v46  ;;  %v45_v53 = vrot.slane %v26_v50, %v861_v47  ;;  %v86_v57 = vrot.slane %v26_v50, %v85_v51 }
  0x10   :  { %558 = vmatpush3.msra.mxu0 %v160_v16  ;;  %599 = vmatpush3.msra.mxu1 %v256_v17  ;;  %v108_v63 = vrot.slane %v26_v50, %v107_v56  ;;  %v397_v50 = vld [vmem:[%s920_s5 + $0x18] sm:$0xff] }
  0x11   :  { %559 = vmatprep.subr.mxu0 %v676_v7  ;;  %600 = vmatprep.subr.mxu1 %v676_v7 }
  0x12   :  { %560 = vmatpush3.msra.mxu0 %v159_v18  ;;  %601 = vmatpush3.msra.mxu1 %v255_v19 }
  0x13   :  { %80 = vperm.xlu1 %651, %v25_v4   ;;  %652 = vset.pattern.permute.xlu0 %v675_v6 }
  0x14   :  { %94 = vperm.xlu0 %652, %v23_v2   ;;  %561 = vmatprep.subr.mxu0 %v676_v7 }
  0x15   :  { %602 = vmatprep.subr.mxu1 %v676_v7  ;;  %562 = vmatpush3.msra.mxu0 %v158_v20 }
  0x16   :  { %603 = vmatpush3.msra.mxu1 %v254_v21  ;;  %563 = vmatprep.subr.mxu0 %v676_v7 }
  0x17   :  { %653 = vset.pattern.permute.xlu1 %v675_v6  ;;  %604 = vmatprep.subr.mxu1 %v676_v7 }
  0x18   :  { %98 = vperm.xlu1 %653, %v24_v3   ;;  %564 = vmatpush3.msra.mxu0 %v157_v22 }
  0x19   :  { %605 = vmatpush3.msra.mxu1 %v253_v23  ;;  %565 = vmatprep.subr.mxu0 %v676_v7 }
  0x1a   :  { %606 = vmatprep.subr.mxu1 %v676_v7  ;;  %566 = vmatpush3.msra.mxu0 %v156_v24 }
  0x1b   :  { %607 = vmatpush3.msra.mxu1 %v252_v25  ;;  %567 = vmatprep.subr.mxu0 %v676_v7 }
  0x1c   :  { %102 = vperm.xlu1 %653, %v25_v4   ;;  %608 = vmatprep.subr.mxu1 %v676_v7 }
  0x1d   :  { %568 = vmatpush3.msra.mxu0 %v155_v26  ;;  %609 = vmatpush3.msra.mxu1 %v251_v27 }
  0x1e   :  { %569 = vmatprep.subr.mxu0 %v676_v7  ;;  %610 = vmatprep.subr.mxu1 %v676_v7 }
  0x1f   :  { %570 = vmatpush3.msra.mxu0 %v154_v28  ;;  %611 = vmatpush3.msra.mxu1 %v250_v29 }
  0x20   :  { %571 = vmatprep.subr.mxu0 %v676_v7  ;;  %612 = vmatprep.subr.mxu1 %v676_v7 }
  0x21   :  { %572 = vmatpush3.msra.mxu0 %v153_v30  ;;  %613 = vmatpush3.msra.mxu1 %v249_v31 }
  0x22   :  { %573 = vmatprep.subr.mxu0 %v676_v7  ;;  %614 = vmatprep.subr.mxu1 %v676_v7 }
  0x23   :  { %574 = vmatpush3.msra.mxu0 %v152_v32  ;;  %615 = vmatpush3.msra.mxu1 %v248_v33 }
  0x24   :  { %575 = vmatprep.subr.mxu0 %v676_v7  ;;  %616 = vmatprep.subr.mxu1 %v676_v7 }
  0x25   :  { %576 = vmatpush3.msra.mxu0 %v151_v34  ;;  %617 = vmatpush3.msra.mxu1 %v247_v35  ;;  %v128_v34 = vld [vmem:[%s919_s2] sm:$0x3] }
  0x26   :  { %577 = vmatprep.subr.mxu0 %v676_v7  ;;  %618 = vmatprep.subr.mxu1 %v676_v7  ;;  %v129_v35 = vsub.f32 0.0, %v128_v34 }
  0x27   :  { %578 = vmatpush3.msra.mxu0 %v150_v36  ;;  %619 = vmatpush3.msra.mxu1 %v246_v37  ;;  %v136_v36 = vrot.slane %v128_v34, %v861_v47 }
  0x28   :  { %579 = vmatprep.subr.mxu0 %v676_v7  ;;  %620 = vmatprep.subr.mxu1 %v676_v7 }
  0x29   :  { %580 = vmatpush3.msra.mxu0 %v149_v38  ;;  %581 = vmatprep.mubr.msk.f32.mxu0 %vm677_vm0, %v676_v7  ;;  %v142_v38 = vrot.slane %v129_v35, %v858_v46 }
  0x2a   :  { %621 = vmatpush3.msra.mxu1 %v245_v39  ;;  %622 = vmatprep.mubr.msk.f32.mxu1 %vm677_vm0, %v676_v7 }
  0x2b   :  { %631 = vmatprep.subr.mxu0 %v676_v7 }
  0x7d   :  { %v51_v41 = vpop.permute.xlu1 %50  ;;  %v30_v42 = vpop.permute.xlu0 %29 }
  0x7e   :  { %v65_v58 = vmul.f32 %v64_v52, %v51_v41  ;;  %v46_v59 = vmul.f32 %v45_v53, %v30_v42 }
  0x80   :  { %v68_v3 = vadd.f32 %v65_v58, %v46_v59 }
  0x81   :  { %v55_v44 = vpop.permute.xlu1 %54  ;;  %v35_v45 = vpop.permute.xlu0 %34 }
  0x82   :  { %v66_v60 = vmul.f32 %v64_v52, %v55_v44  ;;  %v47_v61 = vmul.f32 %v45_v53, %v35_v45 }
  0x84   :  { %v69_v4 = vadd.f32 %v66_v60, %v47_v61 }
  0x85   :  { %v59_v48 = vpop.permute.xlu1 %58  ;;  %v40_v49 = vpop.permute.xlu0 %39 }
  0x86   :  { %v67_v5 = vmul.f32 %v64_v52, %v59_v48  ;;  %v48_v6 = vmul.f32 %v45_v53, %v40_v49  ;;  %v396_v52 = vld [vmem:[%s920_s5 + $0x10] sm:$0xff]  ;;  %v395_v53 = vld [vmem:[%s920_s5 + $0x8] sm:$0xff] }
  0x88   :  { %v70_v14 = vadd.f32 %v67_v5, %v48_v6 }
  0x8a   :  { %v77_v54 = vpop.permute.xlu1 %76  ;;  %v73_v55 = vpop.permute.xlu0 %72 }
  0x8b   :  { %v88_v1 = vmul.f32 %v86_v57, %v77_v54  ;;  %v87_v2 = vmul.f32 %v86_v57, %v73_v55  ;;  %v394_v54 = vld [vmem:[%s920_s5] sm:$0xff] }
  0x8d   :  { %v91_v10 = vadd.f32 %v88_v1, %v69_v4  ;;  %v90_v11 = vadd.f32 %v87_v2, %v68_v3 }
  0x8e   :  { %v81_v62 = vpop.permute.xlu1 %80 }
  0x8f   :  { %v95_v0 = vpop.permute.xlu0 %94  ;;  %v89_v12 = vmul.f32 %v86_v57, %v81_v62 }
  0x90   :  { %v109_v8 = vmul.f32 %v108_v63, %v95_v0 }
  0x91   :  { %v92_v18 = vadd.f32 %v89_v12, %v70_v14 }
  0x92   :  { %v112_v15 = vadd.f32 %v109_v8, %v90_v11 }
  0x93   :  { %v99_v9 = vpop.permute.xlu1 %98 }
  0x94   :  { %v110_v13 = vmul.f32 %v108_v63, %v99_v9  ;;  %v115_v21 = vmul.f32 %v112_v15, %v112_v15 }
  0x96   :  { %v113_v16 = vadd.f32 %v110_v13, %v91_v10 }
  0x97   :  { %v103_v17 = vpop.permute.xlu1 %102 }
  0x98   :  { %v116_v19 = vmul.f32 %v113_v16, %v113_v16  ;;  %v111_v20 = vmul.f32 %v108_v63, %v103_v17 }
  0x9a   :  { %v114_v22 = vadd.f32 %v111_v20, %v92_v18  ;;  %v117_v23 = vadd.f32 %v116_v19, %v115_v21 }
  0x9c   :  { %v118_v24 = vmul.f32 %v114_v22, %v114_v22 }
  0x9e   :  { %v119_v25 = vadd.f32 %v118_v24, %v117_v23 }
  0xa0   :  { %v120_v26 = vadd.f32 1e-05, %v119_v25 }
  0xa2   :  { %654 = vrsqrt.f32 %v120_v26  ;;  %vm123_vm1 = vcmp.eq.f32.partialorder %v120_v26, inf  ;;  %v126_v29 = vand.u32 2147483648, %v120_v26  ;;  %vm125_vm2 = vcmp.eq.f32.partialorder %v120_v26, 0.0 }
  0xaf   :  { %v655_v27 = vpop.eup %654 }
  0xb0   :  { %v122_v28 = vmul.f32 %v655_v27, %v120_v26 }
  0xb2   :  { %v124_v30 = vsel %vm123_vm1, %v120_v26, %v122_v28 }
  0xb3   :  { %v127_v31 = vsel %vm125_vm2, %v126_v29, %v124_v30 }
  0xb4   :  { %v130_v32 = vsub.f32 0.0, %v127_v31 }
  0xb6   :  { %v131_v33 = vmul.f32 1.442695, %v130_v32 }
  0xb8   :  { %656 = vpow2.f32 %v131_v33 }
  0xc5   :  { %v657_v37 = vpop.eup %656 }
  0xc6   :  { %v137_v39 = vsub.f32 %v657_v37, %v136_v36 }
  0xc8   :  { %v138_v40 = vmul.f32 %v137_v39, %v137_v39 }
  0xca   :  { %v143_v41 = vmul.f32 %v142_v38, %v138_v40 }
  0xcc   :  { %v144_v42 = vmul.f32 1.442695, %v143_v41 }
  0xce   :  { %658 = vpow2.f32 %v144_v42 }
  0xdb   :  { %v659_v44 = vpop.eup %658 }
  0xdc   :  { %v146_v45 = vmul.f32 %v659_v44, %v112_v15  ;;  %v147_v48 = vmul.f32 %v659_v44, %v113_v16  ;;  %v148_v49 = vmul.f32 %v659_v44, %v114_v22 }
  0xde   :  { %582 = vmatmul.mubr.f32.vlgmr.msra.gmra.mxu0 %v146_v45  ;;  %623 = vmatmul.mubr.f32.vlgmr.msra.gmra.mxu1 %v146_v45 }
  0xdf   :  { %584 = vmatprep.mubr.msk.f32.mxu0 %vm677_vm0, %v676_v7  ;;  %625 = vmatprep.mubr.msk.f32.mxu1 %vm677_vm0, %v676_v7 }
  0xe0   :  { %632 = vmatpush3.msra.mxu0 %v397_v50 }
  0xe1   :  { %633 = vmatprep.subr.mxu0 %v676_v7 }
  0xe2   :  { %585 = vmatmul.mubr.f32.gmra.mxu0 %v147_v48  ;;  %626 = vmatmul.mubr.f32.gmra.mxu1 %v147_v48 }
  0xe3   :  { %587 = vmatprep.mubr.msk.f32.mxu0 %vm677_vm0, %v676_v7  ;;  %628 = vmatprep.mubr.msk.f32.mxu1 %vm677_vm0, %v676_v7 }
  0xe4   :  { %634 = vmatpush3.msra.mxu0 %v396_v52 }
  0xe5   :  { %635 = vmatprep.subr.mxu0 %v676_v7 }
  0xe6   :  { %588 = vmatmul.mubr.f32.gmra.mxu0 %v148_v49  ;;  %629 = vmatmul.mubr.f32.gmra.mxu1 %v148_v49 }
  0xe7   :  { %639 = vmatprep.mubr.msk.f32.mxu0 %vm677_vm0, %v676_v7  ;;  %636 = vmatpush3.msra.mxu0 %v395_v53 }
  0xe8   :  { %637 = vmatprep.subr.mxu0 %v676_v7 }
  0xe9   :  { %638 = vmatpush3.msra.mxu0 %v394_v54 }
 0x19e   :  { %v231_v55 = vpop.f32.mrf.mxu0  ;;  %v327_v56 = vpop.f32.mrf.mxu1 }
 0x19f   :  { %v341_v0 = vmul.f32 %v327_v56, %v231_v55  ;;  %v398_v55 = vld [vmem:[%s920_s5 + $0x20] sm:$0xff] }
 0x1a0   :  { %v583_v57 = vpop.f32.mrf.mxu0  ;;  %v624_v58 = vpop.f32.mrf.mxu1  ;;  %v402_v56 = vrot.slane %v398_v55, %v861_v47 }
 0x1a2   :  { %v236_v59 = vpop.f32.mrf.mxu0  ;;  %v332_v60 = vpop.f32.mrf.mxu1 }
 0x1a3   :  { %v342_v61 = vmul.f32 %v332_v60, %v236_v59 }
 0x1a4   :  { %v586_v62 = vpop.f32.mrf.mxu0  ;;  %v627_v63 = vpop.f32.mrf.mxu1 }
 0x1a5   :  { %v344_v3 = vadd.f32 %v342_v61, %v341_v0  ;;  %v487_v63 = vrot.slane %v398_v55, %v858_v46 }
 0x1a6   :  { %v241_v1 = vpop.f32.mrf.mxu0  ;;  %v337_v2 = vpop.f32.mrf.mxu1 }
 0x1a7   :  { %v343_v4 = vmul.f32 %v337_v2, %v241_v1 }
 0x1a8   :  { %v589_v5 = vpop.f32.mrf.mxu0  ;;  %v630_v6 = vpop.f32.mrf.mxu1 }
 0x1a9   :  { %v345_v8 = vadd.f32 %v344_v3, %v343_v4  ;;  %v496_v4 = vrot.slane %v398_v55, %v85_v51 }
 0x1ab   :  { %v346_v7 = vadd.f32 1e-05, %v345_v8 }
 0x1ad   :  { %v348_v9 = vsel %vm347_vm3, %v346_v7, -inf  ;;  %v369_v10 = vsel %vm368_vm4, %v346_v7, -inf }
 0x1ae   :  { %v349_v11 = vrot.slane %v348_v9, 4  ;;  %v370_v12 = vrot.slane %v369_v10, 4 }
 0x1b0   :  { %v350_v13 = vmax.f32 %v348_v9, %v349_v11  ;;  %v371_v14 = vmax.f32 %v369_v10, %v370_v12 }
 0x1b2   :  { %v351_v15 = vrot.slane %v350_v13, 2  ;;  %v372_v16 = vrot.slane %v371_v14, 2 }
 0x1b4   :  { %v352_v17 = vmax.f32 %v350_v13, %v351_v15  ;;  %v373_v18 = vmax.f32 %v371_v14, %v372_v16 }
 0x1b6   :  { %v353_v19 = vrot.slane %v352_v17, 1  ;;  %v374_v20 = vrot.slane %v373_v18, 1 }
 0x1b8   :  { %v354_v21 = vmax.f32 %v352_v17, %v353_v19  ;;  %v375_v22 = vmax.f32 %v373_v18, %v374_v20 }
 0x1ba   :  { %v355_v23 = vsub.f32 %v346_v7, %v354_v21  ;;  %v376_v24 = vsub.f32 %v346_v7, %v375_v22 }
 0x1bc   :  { %v356_v25 = vmul.f32 1.442695, %v355_v23  ;;  %v377_v26 = vmul.f32 1.442695, %v376_v24 }
 0x1be   :  { %660 = vpow2.f32 %v356_v25 }
 0x1bf   :  { %662 = vpow2.f32 %v377_v26 }
 0x1cb   :  { %v661_v27 = vpop.eup %660 }
 0x1cc   :  { %v663_v28 = vpop.eup %662  ;;  %v358_v29 = vsel %vm347_vm3, %v661_v27, 0.0 }
 0x1cd   :  { %v359_v30 = vrot.slane %v358_v29, 4  ;;  %v380_v31 = vrot.slane %v663_v28, 4 }
 0x1cf   :  { %v360_v32 = vadd.f32 %v359_v30, %v358_v29  ;;  %v382_v33 = vsel %vm347_vm3, %v380_v31, 0.0 }
 0x1d0   :  { %v383_v34 = vrot.slane %v382_v33, 4 }
 0x1d1   :  { %v361_v35 = vrot.slane %v360_v32, 2 }
 0x1d2   :  { %v384_v36 = vadd.f32 %v383_v34, %v382_v33 }
 0x1d3   :  { %v362_v37 = vadd.f32 %v361_v35, %v360_v32 }
 0x1d4   :  { %v385_v38 = vrot.slane %v384_v36, 2 }
 0x1d5   :  { %v363_v39 = vrot.slane %v362_v37, 1 }
 0x1d6   :  { %v386_v40 = vadd.f32 %v385_v38, %v384_v36 }
 0x1d7   :  { %v364_v41 = vadd.f32 %v363_v39, %v362_v37 }
 0x1d8   :  { %v387_v42 = vrot.slane %v386_v40, 1 }
 0x1d9   :  { %664 = vlog2.f32 %v364_v41 }
 0x1da   :  { %v388_v44 = vadd.f32 %v387_v42, %v386_v40 }
 0x1dc   :  { %666 = vlog2.f32 %v388_v44 }
 0x1e6   :  { %v665_v45 = vpop.eup %664 }
 0x1e7   :  { %v366_v48 = vmul.f32 0.6931472, %v665_v45 }
 0x1e9   :  { %v667_v49 = vpop.eup %666  ;;  %v367_v52 = vadd.f32 %v366_v48, %v354_v21 }
 0x1ea   :  { %v390_v50 = vmul.f32 0.6931472, %v667_v49 }
 0x1ec   :  { %v391_v53 = vadd.f32 %v390_v50, %v375_v22 }
 0x1ee   :  { %v393_v54 = vsel %vm392_vm5, %v367_v52, %v391_v53 }
 0x1ef   :  { %640 = vmatmul.mubr.msk.f32.vlgmr.msra.gmra.mxu0 %vm403_vm6, %v393_v54 }
 0x2af   :  { %v473_v57 = vpop.f32.mrf.mxu0 }
 0x2b0   :  { %v474_v58 = vadd.f32 %v473_v57, %v402_v56 }
 0x2b1   :  { %v641_v59 = vpop.f32.mrf.mxu0 }
 0x2b2   :  { %v505_v60 = vmul.f32 -1.442695, %v474_v58 }
 0x2b4   :  { %668 = vpow2.f32 %v505_v60 }
 0x2c1   :  { %v669_v61 = vpop.eup %668 }
 0x2c2   :  { %v480_v62 = vadd.f32 1.0, %v669_v61 }
 0x2c4   :  { %670 = vrcp.f32 %v480_v62 }
 0x2d1   :  { %v671_v0 = vpop.eup %670 }
 0x2d2   :  { %v483_v1 = vmul.f32 %v671_v0, %v474_v58 }
 0x2d4   :  { %v488_v2 = vmul.f32 %v487_v63, %v483_v1 }
 0x2d6   :  { %v490_v3 = vsel %vm489_vm7, %v488_v2, 0.0 }
 0x2d7   :  { %491 = vadd.xlane.f32.xlu0 %v490_v3 }
 0x360   :  { %v492_v47 = vpop.xlane.xlu0 %491 }
 0x361   :  { %v497_v5 = vadd.f32 %v496_v4, %v492_v47 }
 0x363   :  { %499 = vst.msk [vmem:[%s921_s6] sm:$0x3] %vm498_vm8, %v497_v5 }

</bundles_post_ra>
